<compile_context>
chip_gen: v7x
topology: tpu7x:2x2x1
jax: 0.10.0
libtpu: 0.0.40
codegen_flags: <defaults>
</compile_context>

<pallas_src>
import jax
import jax.numpy as jnp
from jax.experimental import pallas as pl
from jax.experimental.pallas import tpu as pltpu


def _round_up(x, m):
    return ((x + m - 1) // m) * m


def linear_kernel(x_ref, w_ref, b_ref, o_ref, acc_ref):
    # x_ref: (tm, tk) bf16   w_ref: (tk, tn) bf16
    # b_ref: (1, tn) f32     o_ref: (tm, tn) f32   acc_ref: (tm, tn) f32
    k = pl.program_id(2)

    @pl.when(k == 0)
    def _():
        acc_ref[...] = jnp.zeros_like(acc_ref)

    acc_ref[...] += jnp.dot(
        x_ref[...], w_ref[...], preferred_element_type=jnp.float32
    )

    @pl.when(k == pl.num_programs(2) - 1)
    def _():
        o_ref[...] = (acc_ref[...] + b_ref[...]).astype(o_ref.dtype)


def prepare_params(weight, bias, *, compute_dtype=jnp.bfloat16):
    """One-time parameter prep (the probe head is frozen, so do this once,
    outside the hot path): pre-transpose the PyTorch-layout weight
    (num_labels, dim) -> (dim, num_labels) and cast it to the MXU compute
    dtype. Bias stays f32 (added into the f32 accumulator)."""
    w_t = jnp.asarray(weight).T.astype(compute_dtype)          # (D, N)
    b2d = jnp.asarray(bias, dtype=jnp.float32).reshape(1, -1)  # (1, N)
    return w_t, b2d


def linear_classifier_forward(x, w_t, bias2d, *, compute_dtype=jnp.bfloat16):
    """x: (B, ...) features; w_t: (dim, num_labels) pre-transposed weight
    (see prepare_params); bias2d: (1, num_labels) f32. Returns (B, num_labels) f32."""
    B = x.shape[0]
    x2d = x.reshape(B, -1)                      # same as torch .view(B, -1)
    D, N = w_t.shape
    assert x2d.shape[1] == D, "flattened feature dim must match weight"

    # ---- tile selection (generation-friendly defaults) -------------------
    # M: 256-row tiles for large batches; otherwise a single >=8-row tile.
    tm = 256 if B > 256 else _round_up(max(B, 8), 8)
    M_pad = _round_up(B, tm)
    # N: lane-dense 256-wide tiles when possible (fills 2x256 MXU on v6e/v7x),
    # else 128 (v5e MXU native width).
    N_pad = _round_up(N, 128)
    tn = 256 if (N_pad % 256 == 0) else 128
    # K: stream the reduction in <=512-wide slabs with an f32 accumulator.
    D_pad = _round_up(D, 128)
    if D_pad % 512 == 0:
        tk = 512
    elif D_pad % 256 == 0:
        tk = 256
    else:
        tk = 128

    # ---- pad to tile multiples (zero pad of K contributes nothing) -------
    x_p = x2d
    if M_pad != B or D_pad != D:
        x_p = jnp.pad(x2d, ((0, M_pad - B), (0, D_pad - D)))
    x_p = x_p.astype(compute_dtype)

    w_p = w_t
    if D_pad != D or N_pad != N:
        w_p = jnp.pad(w_t, ((0, D_pad - D), (0, N_pad - N)))
    w_p = w_p.astype(compute_dtype)

    b_p = bias2d
    if N_pad != N:
        b_p = jnp.pad(bias2d, ((0, 0), (0, N_pad - N)))
    b_p = b_p.astype(jnp.float32)

    grid = (M_pad // tm, N_pad // tn, D_pad // tk)

    out = pl.pallas_call(
        linear_kernel,
        out_shape=jax.ShapeDtypeStruct((M_pad, N_pad), jnp.float32),
        grid_spec=pltpu.PrefetchScalarGridSpec(
            num_scalar_prefetch=0,
            grid=grid,
            in_specs=[
                pl.BlockSpec((tm, tk), lambda i, j, k: (i, k)),   # activations
                pl.BlockSpec((tk, tn), lambda i, j, k: (k, j)),   # weight slab
                pl.BlockSpec((1, tn), lambda i, j, k: (0, j)),    # bias slice
            ],
            out_specs=pl.BlockSpec((tm, tn), lambda i, j, k: (i, j)),
            scratch_shapes=[pltpu.VMEM((tm, tn), jnp.float32)],
        ),
        compiler_params=pltpu.CompilerParams(
            dimension_semantics=("parallel", "parallel", "arbitrary"),
            vmem_limit_bytes=48 * 1024 * 1024,
        ),
    )(x_p, w_p, b_p)

    return out[:B, :N]


if __name__ == "__main__":
    key = jax.random.PRNGKey(0)
    k_x, k_w = jax.random.split(key)

    # Frozen-backbone features (B, C, H, W) = (2, 4, 16, 16) -> dim = 1024.
    # num_labels = 1000 (module default; NOT a multiple of 128 -> exercises
    # the padded-N path).
    B, C, H, W = 2, 4, 16, 16
    dim = C * H * W
    num_labels = 1000

    x = jax.random.normal(k_x, (B, C, H, W), dtype=jnp.float32)

    # Deterministic init mirroring the PyTorch module: W ~ N(0, 0.01), b = 0.
    weight = 0.01 * jax.random.normal(k_w, (num_labels, dim), dtype=jnp.float32)
    bias = jnp.zeros((num_labels,), dtype=jnp.float32)

    # One-time parameter prep (transpose + bf16 cast), then the hot forward.
    w_t, b2d = prepare_params(weight, bias)
    y = linear_classifier_forward(x, w_t, b2d)
    y = jax.block_until_ready(y)

    assert y.shape == (B, num_labels)

    # Reference 1: exact bf16-input / f32-accumulate math (tight tolerance).
    x2d = x.reshape(B, -1)
    x_bf = x2d.astype(jnp.bfloat16).astype(jnp.float32)
    w_bf = weight.astype(jnp.bfloat16).astype(jnp.float32)
    y_ref_bf = x_bf @ w_bf.T + bias
    assert jnp.allclose(y, y_ref_bf, atol=2e-3, rtol=2e-3)

    # Reference 2: plain f32 nn.Linear semantics (loose tolerance, covers
    # the bf16 input rounding).
    y_ref_f32 = x2d @ weight.T + bias
    assert jnp.allclose(y, y_ref_f32, atol=5e-2, rtol=5e-2)

    print("KERNEL_OK")
</pallas_src>

<mosaic_0001>
module attributes {stable_mosaic.version = 11 : i64} {
  func.func @linear_kernel(%arg0: i32, %arg1: i32, %arg2: i32, %arg3: memref<8x512xbf16, #tpu.memory_space<vmem>>, %arg4: memref<512x256xbf16, #tpu.memory_space<vmem>>, %arg5: memref<1x256xf32, #tpu.memory_space<vmem>>, %arg6: memref<8x256xf32, #tpu.memory_space<vmem>>, %arg7: memref<8x256xf32, #tpu.memory_space<vmem>>) attributes {dimension_semantics = [#tpu.dimension_semantics<parallel>, #tpu.dimension_semantics<parallel>, #tpu.dimension_semantics<arbitrary>], iteration_bounds = array<i64: 1, 4, 2>, scalar_prefetch = 0 : i64, scratch_operands = 1 : i64, tpu.core_type = #tpu.core_type<tc>, window_params = [{transform_indices = @transform_0, window_bounds = array<i64: 8, 512>}, {transform_indices = @transform_1, window_bounds = array<i64: 512, 256>}, {transform_indices = @transform_2, window_bounds = array<i64: 1, 256>}, {transform_indices = @transform_3, window_bounds = array<i64: 8, 256>}]} {
    %c0_i32 = arith.constant 0 : i32
    %0 = arith.cmpi eq, %arg2, %c0_i32 : i32
    %1 = arith.extui %0 : i1 to i32
    %c0_i32_0 = arith.constant 0 : i32
    %2 = arith.cmpi ne, %1, %c0_i32_0 : i32
    scf.if %2 {
      %cst_9 = arith.constant 0.000000e+00 : f32
      %12 = vector.broadcast %cst_9 : f32 to vector<8x256xf32>
      %c0_10 = arith.constant 0 : index
      %c0_11 = arith.constant 0 : index
      %13 = vector.load %arg7[%c0_10, %c0_11] : memref<8x256xf32, #tpu.memory_space<vmem>>, vector<8x256xf32>
      tpu.vector_store %arg7[%c0_10, %c0_11], %12 {strides = array<i32>} : memref<8x256xf32, #tpu.memory_space<vmem>>, vector<8x256xf32>,
    } else {
    }
    %c0 = arith.constant 0 : index
    %c0_1 = arith.constant 0 : index
    %3 = vector.load %arg7[%c0, %c0_1] : memref<8x256xf32, #tpu.memory_space<vmem>>, vector<8x256xf32>
    %c0_2 = arith.constant 0 : index
    %c0_3 = arith.constant 0 : index
    %4 = vector.load %arg3[%c0_2, %c0_3] : memref<8x512xbf16, #tpu.memory_space<vmem>>, vector<8x512xbf16>
    %c0_4 = arith.constant 0 : index
    %c0_5 = arith.constant 0 : index
    %5 = vector.load %arg4[%c0_4, %c0_5] : memref<512x256xbf16, #tpu.memory_space<vmem>>, vector<512x256xbf16>
    %cst = arith.constant dense<0.000000e+00> : vector<8x256xf32>
    %6 = tpu.matmul %4, %5, %cst {dimension_numbers = #tpu.dot_dimension_numbers<[1], [0], [0], [1], [0, 0, 1, 1], [], []>} : vector<8x512xbf16>, vector<512x256xbf16>, vector<8x256xf32> -> vector<8x256xf32>
    %7 = arith.addf %3, %6 : vector<8x256xf32>
    %c0_6 = arith.constant 0 : index
    %c0_7 = arith.constant 0 : index
    %8 = vector.load %arg7[%c0_6, %c0_7] : memref<8x256xf32, #tpu.memory_space<vmem>>, vector<8x256xf32>
    tpu.vector_store %arg7[%c0_6, %c0_7], %7 {strides = array<i32>} : memref<8x256xf32, #tpu.memory_space<vmem>>, vector<8x256xf32>,
    %c1_i32 = arith.constant 1 : i32
    %9 = arith.cmpi eq, %arg2, %c1_i32 : i32
    %10 = arith.extui %9 : i1 to i32
    %c0_i32_8 = arith.constant 0 : i32
    %11 = arith.cmpi ne, %10, %c0_i32_8 : i32
    scf.if %11 {
      %c0_9 = arith.constant 0 : index
      %c0_10 = arith.constant 0 : index
      %12 = vector.load %arg7[%c0_9, %c0_10] : memref<8x256xf32, #tpu.memory_space<vmem>>, vector<8x256xf32>
      %c0_11 = arith.constant 0 : index
      %c0_12 = arith.constant 0 : index
      %13 = vector.load %arg5[%c0_11, %c0_12] : memref<1x256xf32, #tpu.memory_space<vmem>>, vector<1x256xf32>
      %14 = vector.broadcast %13 : vector<1x256xf32> to vector<8x256xf32>
      %15 = arith.addf %12, %14 : vector<8x256xf32>
      %c0_13 = arith.constant 0 : index
      %c0_14 = arith.constant 0 : index
      %16 = vector.load %arg6[%c0_13, %c0_14] : memref<8x256xf32, #tpu.memory_space<vmem>>, vector<8x256xf32>
      tpu.vector_store %arg6[%c0_13, %c0_14], %15 {strides = array<i32>} : memref<8x256xf32, #tpu.memory_space<vmem>>, vector<8x256xf32>,
    } else {
    }
    return
  }
  func.func @transform_0(%arg0: i32, %arg1: i32, %arg2: i32) -> (i32, i32) {
    %c0_i32 = arith.constant 0 : i32
    return %arg0, %arg2 : i32, i32
  }
  func.func @transform_1(%arg0: i32, %arg1: i32, %arg2: i32) -> (i32, i32) {
    %c0_i32 = arith.constant 0 : i32
    return %arg2, %arg1 : i32, i32
  }
  func.func @transform_2(%arg0: i32, %arg1: i32, %arg2: i32) -> (i32, i32) {
    %c0_i32 = arith.constant 0 : i32
    %c0_i32_0 = arith.constant 0 : i32
    return %c0_i32, %arg1 : i32, i32
  }
  func.func @transform_3(%arg0: i32, %arg1: i32, %arg2: i32) -> (i32, i32) {
    %c0_i32 = arith.constant 0 : i32
    return %arg0, %arg1 : i32, i32
  }
}

</mosaic_0001>

<bundles_post_ra>
// kernel: tpu_custom_call.1
= control target key start
LH: loop header
LB: loop body
LE: loop exit
PB: predicated region body
PF: predicated region fallthrough
CT: control target
= control target key end

     0   :  { %s2056_s0 = inlined_call_operand.hbm [shape: bf16[8,1024], index: 0, kind: input, shape index: {}]   ;;  %s2057_s1 = inlined_call_operand.hbm [shape: bf16[1024,1024], index: 1, kind: input, shape index: {}]   ;;  %s2058_s2 = inlined_call_operand.hbm [shape: f32[1,1024], index: 2, kind: input, shape index: {}]   ;;  %s2059_s3 = inlined_call_operand.hbm [shape: f32[8,1024], index: 3, kind: output, shape index: {}]  }
   0x1   :  { %2072 = sst [smem:[#allocation20_spill]] %s2056_s0 }
   0x2   :  { %2073 = sst [smem:[#allocation21_spill]] %s2057_s1 }
   0x3   :  { %2074 = sst [smem:[#allocation22_spill]] %s2059_s3 }
   0x4   :  { %8 = vsyncpa [#allocation4], 0 }
   0x5   :  { %10 = vsyncpa [#allocation4 + $0x1], 0 }
   0x6   :  { %11 = vsyncpa [#allocation7], 0 }
   0x7   :  { %13 = vsyncpa [#allocation7 + $0x1], 0 }
   0x8   :  { %14 = vsyncpa [#allocation5], 0 }
   0x9   :  { %16 = vsyncpa [#allocation5 + $0x1], 0  ;;  %s1579_s12 = smov 0   ;;  %s1581_s13 = smov 0  }
   0xa   :  { %s1583_s14 = smov 0   ;;  %s1585_s15 = smov 0  }
   0xb   :  { %s1587_s16 = smov 0   ;;  %s1589_s17 = smov 0  }
   0xc   :  { %s1591_s18 = smov 0   ;;  %s1593_s19 = smov 0  }
   0xd   :  { %s1595_s20 = smov 0   ;;  %s1597_s21 = smov 0  }
   0xe   :  { %s1599_s22 = smov 0   ;;  %s1601_s23 = smov 0  }
   0xf   :  { %s1603_s24 = smov 0   ;;  %s1605_s25 = smov 0  }
  0x10 LB: > { %2075 = sst [smem:[#allocation14_spill]] %s1529_s20  ;;  %p2061_p0 = scmp.eq.s32.totalorder %s1549_s25, 0  ;;  %s1549_s25 = sphi %s1605_s25, %s22_s25   ;;  %s1545_s24 = sphi %s1603_s24, %s2116_s24   ;;  %s1541_s23 = sphi %s1601_s23, %s2126_s23   ;;  %s1537_s22 = sphi %s1599_s22, %s2114_s22   ;;  %s1533_s21 = sphi %s1597_s21, %s2125_s21   ;;  %s1529_s20 = sphi %s1595_s20, %s2113_s20   ;;  %s1525_s19 = sphi %s1593_s19, %s2124_s19   ;;  %s1521_s18 = sphi %s1591_s18, %s2123_s18   ;;  %s1517_s17 = sphi %s1589_s17, %s2122_s17   ;;  %s1513_s16 = sphi %s1587_s16, %s2121_s16   ;;  %s1509_s15 = sphi %s1585_s15, %s2120_s15   ;;  %s1505_s14 = sphi %s1583_s14, %s2119_s14   ;;  %s1501_s13 = sphi %s1581_s13, %s2118_s13   ;;  %s1497_s12 = sphi %s1579_s12, %s2117_s12  }
  0x11   : > { %2076 = sst [smem:[#allocation15_spill]] %s1537_s22  ;;  %p85_p1 = scmp.ne.s32.totalorder %s1517_s17, %s1513_s16 }
  0x12   : > { %2077 = sst [smem:[#allocation16_spill]] %s1545_s24  ;;  %p2060_p4 = scmp.lt.s32.totalorder %s1549_s25, 8 }
  0x13   : > { %p87_p3 = por %p85_p1, %p2061_p0  ;;  %s190_s28 = sand.u32 1, %s1549_s25  }
  0x14   : > { %s192_s29 = sand.u32 1, %s1517_s17   ;;  %s975_s4 = sshll.u32 %s1545_s24, 1 }
  0x15   : > { %s973_s30 = sshll.u32 %s192_s29, 9  ;;  %s1062_s5 = sshll.u32 %s1541_s23, 9 }
  0x16   : > { %s194_s6 = scalar_lea.vmem [#allocation6], %s973_s30  ;;  %s201_s8 = sadd.s32 %s1062_s5, %s975_s4 }
  0x17   : > { %s204_s7 = sshll.u32 %s194_s6, 4  ;;  %s977_s9 = sshll.u32 %s201_s8, 6  ;;  %s1663_s7 = int_to_ptr.vmem [resolvable:$true] %s204_s7 }
  0x18   : > { %p1667_p5 = pnand %p2060_p4, %p87_p3  ;;  %s2079_s1 = sld [smem:[#allocation21_spill]] }
  0x19   : > { %p981_p6 = scmp.ge.s32.totalorder %s1549_s25, 1  ;;  %s1677_s29 = scalar_lea.sflag [#allocation7], %s190_s28 }
  0x1a   : > { %p1307_p8 = pneg %p1667_p5 }
  0x1e   : > { %s1674_s26 = scalar_lea.hbm %s2079_s1, %s977_s9  ;;  %s1310_s5 = scalar_lea.hbm %s2079_s1, 65536 }
  0x1f   : > { %s1305_s30 = scalar_lea.hbm %s1674_s26, 8192  ;;  %p1311_p11 = scmp.lt.u32.totalorder %s1674_s26, %s2079_s1 }
  0x20   : > { %p1306_p7 = scmp.ne.s32.totalorder %s1674_s26, %s1305_s30  ;;  %p1312_p12 = scmp.lt.u32.totalorder %s1310_s5, %s1305_s30 }
  0x21   : > { %p1314_p1 = scmp.lt.u32.totalorder %s1305_s30, %s1674_s26 }
  0x22   : > { %p1308_p9 = pnand %p1307_p8, %p1306_p7  ;;  %p1313_p13 = por %p1312_p12, %p1311_p11 }
  0x24   : > { %p1309_p10 = pneg %p1308_p9  ;;  %p1315_p3 = por %p1314_p1, %p1313_p13 }
  0x26   : > { %p1316_p4 = pnand %p1315_p3, %p1309_p10 }
  0x28   : > { %1319 = shalt.err (!%p1316_p4)
}
  0x29   : > { %s1320_s28 = scalar_lea.vmem %s1663_s7, 8192  ;;  %s1551_s9 = smov [#allocation6]  }
  0x2a   : > { %p1321_p7 = scmp.ne.s32.totalorder %s1663_s7, %s1320_s28  ;;  %s1325_s11 = sshll.u32 %s1551_s9, 4  ;;  %s1326_s11 = int_to_ptr.vmem [resolvable:$false] %s1325_s11 }
  0x2b   : > { %s1327_s27 = scalar_lea.vmem %s1326_s11, 16384  ;;  %p1328_p0 = scmp.lt.s32.totalorder %s1663_s7, %s1326_s11 }
  0x2c   : > { %p1323_p9 = pnand %p1321_p7, %p1307_p8  ;;  %p1329_p11 = scmp.lt.s32.totalorder %s1327_s27, %s1320_s28 }
  0x2e   : > { %p1324_p2 = pneg %p1323_p9  ;;  %p1330_p12 = por %p1329_p11, %p1328_p0 }
  0x30   : > { %p1331_p13 = pnand %p1330_p12, %p1324_p2 }
  0x32   : > { %1334 = shalt.err (!%p1331_p13)
}
  0x33   : > { %s1552_s30 = smov 512   ;;  %s1553_s4 = smov 128  }
  0x34   : > { %s1554_s5 = smov 8   ;;  %p231_p0 = scmp.lt.s32.totalorder %s1549_s25, 9 }
  0x35   : > { %1079 = dma.hbm_to_vmem [thread:$0]  (!%p1667_p5), %s1674_s26, 8192, %s1663_s7, %s1677_s29, %s1552_s30, %s1553_s4, %s1554_s5  }
  0x36   : > { %p1708_p2 = pnand %p981_p6, %p231_p0  ;;  %s1713_s8 = sadd.s32 4294967295, %s1549_s25  }
  0x37   : > { %s34_s28 = sadd.s32 1, %s1541_s23  ;;  %s50_s9 = sadd.s32 1, %s1529_s20 }
  0x38   : > { %s2080_s6 = scalar_select %p1708_p2, 1, 0 }
  0x39   : > { %p35_p4 = scmp.ge.s32.totalorder %s34_s28, 2  ;;  %p57_p5 = scmp.ne.s32.totalorder %s1529_s20, %s1525_s19 }
  0x3a   : > { %p63_p8 = scmp.ne.s32.totalorder %s1525_s19, %s1521_s18  ;;  %s2082_s26 = sadd.s32 1, %s1545_s24 }
  0x3b   : > { %s2128_s28 = smov (%p35_p4, %s34_s28), 0  ;;  %s2130_s26 = smov (!%p35_p4, %s2082_s26), %s1545_s24 }
  0x3c   : > { %2081 = sst [smem:[#allocation17_spill]] %s2128_s28  ;;  %s46_s7 = ssub.s32 %s1541_s23, %s2128_s28 }
  0x3d   : > { %p2083_p6 = scmp.eq.s32.totalorder %s1549_s25, 0  ;;  %p39_p1 = scmp.ge.s32.totalorder %s2130_s26, 4 }
  0x3e   : > { %p48_p3 = scmp.eq.s32.totalorder %s46_s7, 0  ;;  %p2065_p7 = scmp.eq.s32.totalorder %s1713_s8, 0 }
  0x3f   : > { %p1730_p10 = por %p2083_p6, %p57_p5  ;;  %s169_s18 = sand.u32 1, %s1529_s20  }
  0x40   : > { %s2132_s26 = smov (%p39_p1, %s2130_s26), 0  ;;  %p1743_p9 = por %p2065_p7, %p63_p8 }
  0x41   : > { %2085 = sst [smem:[#allocation18_spill]] %s2132_s26  ;;  %s1749_s30 = ssub.s32 %s1545_s24, %s2132_s26 }
  0x42   : > { %s1739_s11 = scalar_select %p48_p3, %s1529_s20, %s50_s9  }
  0x43   : > { %s2087_s27 = scalar_select %p1743_p9, 1, 0 }
  0x44   : > { %2086 = sst [smem:[#allocation19_spill]] %s1739_s11  ;;  %s75_s4 = sor.u32 %s1749_s30, %s46_s7 }
  0x45   : > { %p2088_p11 = scmp.ne.s32.totalorder %s1513_s16, %s1509_s15  ;;  %p76_p13 = scmp.eq.s32.totalorder %s75_s4, 0 }
  0x46   : > { %s970_s1 = sshll.u32 %s169_s18, 4  ;;  %s1061_s28 = sshll.u32 %s1541_s23, 8 }
  0x47   : > { %p1757_p12 = por %p2088_p11, %p2065_p7  ;;  %s2090_s9 = sadd.s32 1, %s1517_s17 }
  0x48   : > { %s1765_s11 = scalar_select %p76_p13, %s1517_s17, %s2090_s9  }
  0x49   : > { %s2089_s5 = scalar_select %p1757_p12, 1, 0 }
  0x4a   : > { %s2091_s0 = sld [smem:[#allocation20_spill]]  ;;  %s173_s15 = scalar_lea.vmem [#allocation3], %s970_s1 }
  0x4b   : > { %s183_s7 = sshll.u32 %s173_s15, 4  ;;  %p2092_p0 = scmp.lt.s32.totalorder %s1549_s25, 8  ;;  %s1780_s7 = int_to_ptr.vmem [resolvable:$true] %s183_s7 }
  0x4c   : > { %s170_s9 = scalar_lea.sflag [#allocation4], %s169_s18 }
  0x4d   : > { %p1776_p4 = pnand %p2092_p0, %p1730_p10 }
  0x4f   : > { %p1337_p8 = pneg %p1776_p4 }
  0x50   : > { %s1770_s22 = scalar_lea.hbm %s2091_s0, %s1061_s28  ;;  %s1340_s28 = scalar_lea.hbm %s2091_s0, 512 }
  0x51   : > { %s1335_s3 = scalar_lea.hbm %s1770_s22, 256  ;;  %p1341_p10 = scmp.lt.u32.totalorder %s1770_s22, %s2091_s0 }
  0x52   : > { %p1336_p5 = scmp.ne.s32.totalorder %s1770_s22, %s1335_s3  ;;  %p1342_p3 = scmp.lt.u32.totalorder %s1340_s28, %s1335_s3 }
  0x53   : > { %p1344_p13 = scmp.lt.u32.totalorder %s1335_s3, %s1770_s22 }
  0x54   : > { %p1338_p6 = pnand %p1337_p8, %p1336_p5  ;;  %p1343_p11 = por %p1342_p3, %p1341_p10 }
  0x56   : > { %p1339_p1 = pneg %p1338_p6  ;;  %p1345_p0 = por %p1344_p13, %p1343_p11 }
  0x58   : > { %p1346_p7 = pnand %p1345_p0, %p1339_p1 }
  0x5a   : > { %1349 = shalt.err (!%p1346_p7)
}
  0x5b   : > { %s1350_s18 = scalar_lea.vmem %s1780_s7, 256  ;;  %s1555_s1 = smov [#allocation3]  }
  0x5c   : > { %p1351_p5 = scmp.ne.s32.totalorder %s1780_s7, %s1350_s18  ;;  %s1355_s20 = sshll.u32 %s1555_s1, 4  ;;  %s1356_s20 = int_to_ptr.vmem [resolvable:$false] %s1355_s20 }
  0x5d   : > { %s1357_s10 = scalar_lea.vmem %s1356_s20, 512  ;;  %p1358_p9 = scmp.lt.s32.totalorder %s1780_s7, %s1356_s20 }
  0x5e   : > { %p1353_p6 = pnand %p1351_p5, %p1337_p8  ;;  %p1359_p10 = scmp.lt.s32.totalorder %s1357_s10, %s1350_s18 }
  0x60   : > { %p1354_p12 = pneg %p1353_p6  ;;  %p1360_p3 = por %p1359_p10, %p1358_p9 }
  0x62   : > { %p1361_p11 = pnand %p1360_p3, %p1354_p12 }
  0x64   : > { %1364 = shalt.err (!%p1361_p11)
}
  0x65   : > { %1076 = dma.hbm_to_vmem [thread:$0]  (!%p1776_p4), %s1770_s22, 256, %s1780_s7, %s170_s9  }
  0x66   : > { %s967_s3 = sadd.s32 4294967294, %s1549_s25   ;;  %p102_p7 = scmp.eq.s32.totalorder %s1749_s30, 0 }
  0x67   : > { %s104_s28 = sadd.s32 1, %s1505_s14  ;;  %p111_p9 = scmp.ne.s32.totalorder %s1505_s14, %s1501_s13 }
  0x68   : > { %s1813_s4 = scalar_select %p102_p7, %s1505_s14, %s104_s28  }
  0x69   : > { %p2094_p12 = scmp.eq.s32.totalorder %s1549_s25, 0  ;;  %p117_p1 = scmp.ne.s32.totalorder %s1501_s13, %s1497_s12 }
  0x6a   : > { %p143_p13 = scmp.eq.s32.totalorder %s1713_s8, 7  ;;  %p149_p0 = scmp.eq.s32.totalorder %s967_s3, 7 }
  0x6b   : > { %p1817_p8 = por %p111_p9, %p2094_p12  ;;  %p2096_p5 = scmp.eq.s32.totalorder %s1713_s8, 0 }
  0x6c   : > { %s216_s22 = sand.u32 1, %s1505_s14   ;;  %p1831_p4 = por %p143_p13, %p111_p9 }
  0x6d   : > { %p1826_p6 = por %p117_p1, %p2096_p5  ;;  %p1835_p10 = por %p149_p0, %p117_p1 }
  0x6e   : > { %s2098_s30 = scalar_select %p1831_p4, 1, 0 }
  0x6f   : > { %s2097_s18 = scalar_select %p1826_p6, 1, 0 }
  0x70   : > { %s2099_s7 = scalar_select %p1835_p10, 1, 0 }
  0x71   : > { %s978_s9 = sshll.u32 %s216_s22, 1  ;;  %s1063_s1 = sshll.u32 %s1545_s24, 5 }
  0x72   : > { %s1843_s3 = scalar_lea.hbm %s2058_s2, %s1063_s1  ;;  %s218_s28 = scalar_lea.vmem [#allocation8], %s978_s9 }
  0x73   : > { %s226_s0 = sshll.u32 %s218_s28, 4  ;;  %p2100_p3 = scmp.lt.s32.totalorder %s1549_s25, 8  ;;  %s227_s0 = int_to_ptr.vmem [resolvable:$true] %s226_s0 }
  0x74   : > { %s1365_s22 = scalar_lea.hbm %s1843_s3, 32  ;;  %s1370_s15 = scalar_lea.hbm %s2058_s2, 128 }
  0x75   : > { %p1849_p11 = pnand %p2100_p3, %p1817_p8  ;;  %p1366_p7 = scmp.ne.s32.totalorder %s1843_s3, %s1365_s22 }
  0x76   : > { %p1371_p8 = scmp.lt.u32.totalorder %s1843_s3, %s2058_s2  ;;  %p1372_p13 = scmp.lt.u32.totalorder %s1370_s15, %s1365_s22 }
  0x77   : > { %p1367_p9 = pneg %p1849_p11  ;;  %p1374_p5 = scmp.lt.u32.totalorder %s1365_s22, %s1843_s3 }
  0x78   : > { %p1373_p0 = por %p1372_p13, %p1371_p8 }
  0x79   : > { %p1368_p12 = pnand %p1367_p9, %p1366_p7 }
  0x7a   : > { %p1375_p3 = por %p1374_p5, %p1373_p0 }
  0x7b   : > { %p1369_p1 = pneg %p1368_p12 }
  0x7d   : > { %p1376_p10 = pnand %p1375_p3, %p1369_p1 }
  0x7f   : > { %1379 = shalt.err (!%p1376_p10)
}
  0x80   : > { %s1380_s28 = scalar_lea.vmem %s227_s0, 32  ;;  %s1556_s24 = smov [#allocation8]  }
  0x81   : > { %p1381_p4 = scmp.ne.s32.totalorder %s227_s0, %s1380_s28  ;;  %s1385_s1 = sshll.u32 %s1556_s24, 4  ;;  %s1386_s1 = int_to_ptr.vmem [resolvable:$false] %s1385_s1 }
  0x82   : > { %s1387_s9 = scalar_lea.vmem %s1386_s1, 64  ;;  %p1388_p6 = scmp.lt.s32.totalorder %s227_s0, %s1386_s1 }
  0x83   : > { %p1383_p7 = pnand %p1381_p4, %p1367_p9  ;;  %p1389_p2 = scmp.lt.s32.totalorder %s1387_s9, %s1380_s28 }
  0x85   : > { %p1384_p12 = pneg %p1383_p7  ;;  %p1390_p8 = por %p1389_p2, %p1388_p6 }
  0x87   : > { %p1391_p13 = pnand %p1390_p8, %p1384_p12 }
  0x89   : > { %1394 = shalt.err (!%p1391_p13)
}
  0x8a   : > { %1082 = dma.hbm_to_vmem [thread:$0]  (!%p1849_p11), %s1843_s3, 32, %s227_s0, %s1677_s29  }
  0x8b   : > { %p2102_p10 = scmp.ne.s32.totalorder %s2080_s6, 0 }
  0x8c   : > { %s237_s22 = sand.u32 (!%p2102_p10), 1, %s1525_s19   ;;  %p2103_p4 = scmp.ne.s32.totalorder (!%p2102_p10), %s2087_s27, 0 }
  0x8d   : > { %235 = sbr.rel (%p2102_p10) target bundleno = 488 (0x1e8), region = 32  ;;  %s1878_s15 = sshll.u32 (!%p2102_p10), %s237_s22, 4 }
  0x8e   : > { %s238_s24 = scalar_lea.sflag (!%p2102_p10), [#allocation4], %s237_s22  ;;  %s241_s20 = scalar_lea.vmem (!%p2102_p10), [#allocation3], %s1878_s15 }
  0x94   : > { %1480 = dma.done.wait (%p2103_p4), %s238_s24, 256  }
  0x95   : > { %1482 = vsyncadd (%p2103_p4), %s238_s24, 4294967040  ;;  %s246_s0 = sand.u32 1, %s1713_s8   ;;  %s248_s29 = sand.u32 1, %s1513_s16  }
  0x96   : > { %s983_s6 = sshll.u32 %s248_s29, 9  ;;  %s247_s26 = scalar_lea.sflag [#allocation7], %s246_s0 }
  0x97   : > { %s1887_s3 = scalar_lea.vmem [#allocation6], %s983_s6  ;;  %p2104_p2 = scmp.ne.s32.totalorder %s2089_s5, 0 }
  0x99   : > { %1484 = dma.done.wait (%p2104_p2), %s247_s26, 8192  }
  0x9a   : > { %1486 = vsyncadd (%p2104_p2), %s247_s26, 4294959104  ;;  %s1894_s10 = sand.u32 1, %s1501_s13   ;;  %p2105_p6 = scmp.ne.s32.totalorder %s2097_s18, 0 }
  0x9b   : > { %s984_s27 = sshll.u32 %s1894_s10, 1 }
  0x9c   : > { %s1897_s28 = scalar_lea.vmem [#allocation8], %s984_s27 }
  0x9d   : > { %1488 = dma.done.wait (%p2105_p6), %s247_s26, 32  }
  0x9e   : > { %1490 = vsyncadd (%p2105_p6), %s247_s26, 4294967264  ;;  %s985_s8 = sshll.u32 %s1894_s10, 4  ;;  %p986_p11 = scmp.ne.s32.totalorder %s1533_s21, 0 }
  0x9f   : > { %s1904_s1 = scalar_lea.vmem [#allocation9], %s985_s8  ;;  %v1557_v0 = vmov (!%p986_p11), 0.0  }
  0xa0   : > { %300 = sbr.rel (%p986_p11) target bundleno = 167 (0xa7), region = 48  ;;  %301 = vst [vmem:[#allocation2] sm:$0xff] (!%p986_p11), %v1557_v0  ;;  %302 = vst [vmem:[#allocation2 + $0x8] sm:$0xff] (!%p986_p11), %v1557_v0 }
  0xa7 PF: > { %v1205_v1 = vld [vmem:[%s1887_s3 + $0x4] ss:$8 sps:$4 sm:$0xff]   ;;  %v1209_v3 = vld [vmem:[%s1887_s3] ss:$8 sps:$4 sm:$0xff]   ;;  %v1211_v5 = vld [vmem:[%s1887_s3 + $0x14] ss:$8 sps:$4 sm:$0xff]  }
  0xa8   : > { %v1207_v2 = vld [vmem:[%s1887_s3 + $0x104] ss:$8 sps:$4 sm:$0xff]   ;;  %705 = vmatprep.subr.bf16.mxu0 %v1205_v1  ;;  %v1210_v4 = vld [vmem:[%s1887_s3 + $0x100] ss:$8 sps:$4 sm:$0xff]   ;;  %v1213_v6 = vld [vmem:[%s1887_s3 + $0x114] ss:$8 sps:$4 sm:$0xff]  }
  0xa9   : > { %746 = vmatprep.subr.bf16.mxu1 %v1207_v2  ;;  %706 = vmatpush1.bf16.msra.mxu0 %v1209_v3  ;;  %v1215_v7 = vld [vmem:[%s1887_s3 + $0x10] ss:$8 sps:$4 sm:$0xff]   ;;  %v1217_v9 = vld [vmem:[%s1887_s3 + $0x24] ss:$8 sps:$4 sm:$0xff]   ;;  %v1221_v11 = vld [vmem:[%s1887_s3 + $0x20] ss:$8 sps:$4 sm:$0xff]  }
  0xaa   : > { %747 = vmatpush1.bf16.msra.mxu1 %v1210_v4  ;;  %707 = vmatprep.subr.bf16.mxu0 %v1211_v5  ;;  %v1216_v8 = vld [vmem:[%s1887_s3 + $0x110] ss:$8 sps:$4 sm:$0xff]   ;;  %v1219_v10 = vld [vmem:[%s1887_s3 + $0x124] ss:$8 sps:$4 sm:$0xff]   ;;  %v1222_v12 = vld [vmem:[%s1887_s3 + $0x120] ss:$8 sps:$4 sm:$0xff]  }
  0xab   : > { %748 = vmatprep.subr.bf16.mxu1 %v1213_v6  ;;  %v1223_v13 = vld [vmem:[%s1887_s3 + $0x34] ss:$8 sps:$4 sm:$0xff]   ;;  %v1227_v15 = vld [vmem:[%s1887_s3 + $0x30] ss:$8 sps:$4 sm:$0xff]   ;;  %v1229_v17 = vld [vmem:[%s1887_s3 + $0x44] ss:$8 sps:$4 sm:$0xff]  }
  0xac   : > { %v1225_v14 = vld [vmem:[%s1887_s3 + $0x134] ss:$8 sps:$4 sm:$0xff]   ;;  %v1228_v16 = vld [vmem:[%s1887_s3 + $0x130] ss:$8 sps:$4 sm:$0xff]   ;;  %v1231_v18 = vld [vmem:[%s1887_s3 + $0x144] ss:$8 sps:$4 sm:$0xff]  }
  0xad   : > { %708 = vmatpush1.bf16.msra.mxu0 %v1215_v7  ;;  %v1233_v19 = vld [vmem:[%s1887_s3 + $0x40] ss:$8 sps:$4 sm:$0xff]   ;;  %v1235_v21 = vld [vmem:[%s1887_s3 + $0x54] ss:$8 sps:$4 sm:$0xff]   ;;  %v1239_v23 = vld [vmem:[%s1887_s3 + $0x50] ss:$8 sps:$4 sm:$0xff]  }
  0xae   : > { %749 = vmatpush1.bf16.msra.mxu1 %v1216_v8  ;;  %709 = vmatprep.subr.bf16.mxu0 %v1217_v9  ;;  %v1234_v20 = vld [vmem:[%s1887_s3 + $0x140] ss:$8 sps:$4 sm:$0xff]   ;;  %v1237_v22 = vld [vmem:[%s1887_s3 + $0x154] ss:$8 sps:$4 sm:$0xff]   ;;  %v1240_v24 = vld [vmem:[%s1887_s3 + $0x150] ss:$8 sps:$4 sm:$0xff]  }
  0xaf   : > { %750 = vmatprep.subr.bf16.mxu1 %v1219_v10  ;;  %v1241_v25 = vld [vmem:[%s1887_s3 + $0x64] ss:$8 sps:$4 sm:$0xff]   ;;  %v1245_v27 = vld [vmem:[%s1887_s3 + $0x60] ss:$8 sps:$4 sm:$0xff]   ;;  %v1247_v29 = vld [vmem:[%s1887_s3 + $0x74] ss:$8 sps:$4 sm:$0xff]  }
  0xb0   : > { %v1243_v26 = vld [vmem:[%s1887_s3 + $0x164] ss:$8 sps:$4 sm:$0xff]   ;;  %v1246_v28 = vld [vmem:[%s1887_s3 + $0x160] ss:$8 sps:$4 sm:$0xff]   ;;  %v1249_v30 = vld [vmem:[%s1887_s3 + $0x174] ss:$8 sps:$4 sm:$0xff]  }
  0xb1   : > { %710 = vmatpush1.bf16.msra.mxu0 %v1221_v11  ;;  %v1251_v31 = vld [vmem:[%s1887_s3 + $0x70] ss:$8 sps:$4 sm:$0xff]   ;;  %v1253_v33 = vld [vmem:[%s1887_s3 + $0x84] ss:$8 sps:$4 sm:$0xff]   ;;  %v1257_v35 = vld [vmem:[%s1887_s3 + $0x80] ss:$8 sps:$4 sm:$0xff]  }
  0xb2   : > { %751 = vmatpush1.bf16.msra.mxu1 %v1222_v12  ;;  %711 = vmatprep.subr.bf16.mxu0 %v1223_v13  ;;  %v1252_v32 = vld [vmem:[%s1887_s3 + $0x170] ss:$8 sps:$4 sm:$0xff]   ;;  %v1255_v34 = vld [vmem:[%s1887_s3 + $0x184] ss:$8 sps:$4 sm:$0xff]   ;;  %v1258_v36 = vld [vmem:[%s1887_s3 + $0x180] ss:$8 sps:$4 sm:$0xff]  }
  0xb3   : > { %752 = vmatprep.subr.bf16.mxu1 %v1225_v14  ;;  %v1259_v37 = vld [vmem:[%s1887_s3 + $0x94] ss:$8 sps:$4 sm:$0xff]   ;;  %v1263_v39 = vld [vmem:[%s1887_s3 + $0x90] ss:$8 sps:$4 sm:$0xff]   ;;  %v1265_v41 = vld [vmem:[%s1887_s3 + $0xa4] ss:$8 sps:$4 sm:$0xff]  }
  0xb4   : > { %v1261_v38 = vld [vmem:[%s1887_s3 + $0x194] ss:$8 sps:$4 sm:$0xff]   ;;  %v1264_v40 = vld [vmem:[%s1887_s3 + $0x190] ss:$8 sps:$4 sm:$0xff]   ;;  %v1267_v42 = vld [vmem:[%s1887_s3 + $0x1a4] ss:$8 sps:$4 sm:$0xff]  }
  0xb5   : > { %712 = vmatpush1.bf16.msra.mxu0 %v1227_v15  ;;  %v1269_v43 = vld [vmem:[%s1887_s3 + $0xa0] ss:$8 sps:$4 sm:$0xff]   ;;  %v1271_v45 = vld [vmem:[%s1887_s3 + $0xb4] ss:$8 sps:$4 sm:$0xff]   ;;  %v1275_v50 = vld [vmem:[%s1887_s3 + $0xb0] ss:$8 sps:$4 sm:$0xff]  }
  0xb6   : > { %753 = vmatpush1.bf16.msra.mxu1 %v1228_v16  ;;  %713 = vmatprep.subr.bf16.mxu0 %v1229_v17  ;;  %v1270_v44 = vld [vmem:[%s1887_s3 + $0x1a0] ss:$8 sps:$4 sm:$0xff]   ;;  %v1273_v46 = vld [vmem:[%s1887_s3 + $0x1b4] ss:$8 sps:$4 sm:$0xff]   ;;  %v1276_v51 = vld [vmem:[%s1887_s3 + $0x1b0] ss:$8 sps:$4 sm:$0xff]  }
  0xb7   : > { %754 = vmatprep.subr.bf16.mxu1 %v1231_v18  ;;  %v305_v47 = vld [vmem:[%s241_s20] sm:$0xff]  ;;  %v306_v49 = vld [vmem:[%s241_s20 + $0x8] sm:$0xff]  ;;  %p1055_p9 = scmp.ne.s32.totalorder %s1533_s21, 1 }
  0xb8   : > { %v988_v48 = vcombine.high %v305_v47, %v305_v47  ;;  %v990_v52 = vcombine.high %v306_v49, %v306_v49  ;;  %v1277_v53 = vld [vmem:[%s1887_s3 + $0xc4] ss:$8 sps:$4 sm:$0xff]   ;;  %v1281_v55 = vld [vmem:[%s1887_s3 + $0xc0] ss:$8 sps:$4 sm:$0xff]   ;;  %v1283_v57 = vld [vmem:[%s1887_s3 + $0xd4] ss:$8 sps:$4 sm:$0xff]   ;;  %v987_v5 = vcombine.low %v305_v47, %v305_v47  ;;  %v989_v6 = vcombine.low %v306_v49, %v306_v49 }
  0xb9   : > { %714 = vmatpush1.bf16.msra.mxu0 %v1233_v19  ;;  %v1279_v54 = vld [vmem:[%s1887_s3 + $0x1c4] ss:$8 sps:$4 sm:$0xff]   ;;  %v1282_v56 = vld [vmem:[%s1887_s3 + $0x1c0] ss:$8 sps:$4 sm:$0xff]   ;;  %v1285_v58 = vld [vmem:[%s1887_s3 + $0x1d4] ss:$8 sps:$4 sm:$0xff]  }
  0xba   : > { %755 = vmatpush1.bf16.msra.mxu1 %v1234_v20  ;;  %715 = vmatprep.subr.bf16.mxu0 %v1235_v21  ;;  %v1287_v59 = vld [vmem:[%s1887_s3 + $0xd0] ss:$8 sps:$4 sm:$0xff]   ;;  %v1289_v61 = vld [vmem:[%s1887_s3 + $0xe4] ss:$8 sps:$4 sm:$0xff]   ;;  %v1293_v63 = vld [vmem:[%s1887_s3 + $0xe0] ss:$8 sps:$4 sm:$0xff]   ;;  %v799_v21 = vlaneseq (!%p1055_p9) }
  0xbb   : > { %756 = vmatprep.subr.bf16.mxu1 %v1237_v22  ;;  %737 = vmatprep.mubr.bf16.mxu0 %v988_v48  ;;  %v1288_v60 = vld [vmem:[%s1887_s3 + $0x1d0] ss:$8 sps:$4 sm:$0xff]   ;;  %v1291_v62 = vld [vmem:[%s1887_s3 + $0x1e4] ss:$8 sps:$4 sm:$0xff]   ;;  %v1294_v0 = vld [vmem:[%s1887_s3 + $0x1e0] ss:$8 sps:$4 sm:$0xff]  }
  0xbc   : > { %778 = vmatprep.mubr.bf16.mxu1 %v990_v52  ;;  %v1295_v1 = vld [vmem:[%s1887_s3 + $0xf4] ss:$8 sps:$4 sm:$0xff]   ;;  %v1299_v3 = vld [vmem:[%s1887_s3 + $0xf0] ss:$8 sps:$4 sm:$0xff]   ;;  %v800_v22 = vshrl.u32 (!%p1055_p9), %v799_v21, 7 }
  0xbd   : > { %716 = vmatpush1.bf16.msra.mxu0 %v1239_v23  ;;  %v1297_v2 = vld [vmem:[%s1887_s3 + $0x1f4] ss:$8 sps:$4 sm:$0xff]   ;;  %v1300_v4 = vld [vmem:[%s1887_s3 + $0x1f0] ss:$8 sps:$4 sm:$0xff]   ;;  %v797_v23 = vld [vmem:[%s1897_s28] sm:$0x3] (!%p1055_p9) }
  0xbe   : > { %757 = vmatpush1.bf16.msra.mxu1 %v1240_v24  ;;  %717 = vmatprep.subr.bf16.mxu0 %v1241_v25  ;;  %v303_v8 = vld [vmem:[#allocation2] sm:$0xff]  ;;  %v304_v12 = vld [vmem:[#allocation2 + $0x8] sm:$0xff]  ;;  %v801_v24 = vsub.s32 (!%p1055_p9), 0, %v800_v22  ;;  %v805_v25 = vsub.s32 (!%p1055_p9), 1, %v800_v22 }
  0xbf   : > { %758 = vmatprep.subr.bf16.mxu1 %v1243_v26 }
  0xc1   : > { %718 = vmatpush1.bf16.msra.mxu0 %v1245_v27 }
  0xc2   : > { %759 = vmatpush1.bf16.msra.mxu1 %v1246_v28  ;;  %719 = vmatprep.subr.bf16.mxu0 %v1247_v29  ;;  %v802_v28 = vrot.slane (!%p1055_p9), %v797_v23, %v801_v24  ;;  %v806_v29 = vrot.slane (!%p1055_p9), %v797_v23, %v805_v25 }
  0xc3   : > { %760 = vmatprep.subr.bf16.mxu1 %v1249_v30 }
  0xc5   : > { %720 = vmatpush1.bf16.msra.mxu0 %v1251_v31 }
  0xc6   : > { %761 = vmatpush1.bf16.msra.mxu1 %v1252_v32  ;;  %721 = vmatprep.subr.bf16.mxu0 %v1253_v33 }
  0xc7   : > { %762 = vmatprep.subr.bf16.mxu1 %v1255_v34 }
  0xc9   : > { %722 = vmatpush1.bf16.msra.mxu0 %v1257_v35 }
  0xca   : > { %763 = vmatpush1.bf16.msra.mxu1 %v1258_v36  ;;  %723 = vmatprep.subr.bf16.mxu0 %v1259_v37 }
  0xcb   : > { %764 = vmatprep.subr.bf16.mxu1 %v1261_v38 }
  0xcd   : > { %724 = vmatpush1.bf16.msra.mxu0 %v1263_v39 }
  0xce   : > { %765 = vmatpush1.bf16.msra.mxu1 %v1264_v40  ;;  %725 = vmatprep.subr.bf16.mxu0 %v1265_v41 }
  0xcf   : > { %766 = vmatprep.subr.bf16.mxu1 %v1267_v42 }
  0xd1   : > { %726 = vmatpush1.bf16.msra.mxu0 %v1269_v43 }
  0xd2   : > { %767 = vmatpush1.bf16.msra.mxu1 %v1270_v44  ;;  %727 = vmatprep.subr.bf16.mxu0 %v1271_v45 }
  0xd3   : > { %768 = vmatprep.subr.bf16.mxu1 %v1273_v46 }
  0xd5   : > { %728 = vmatpush1.bf16.msra.mxu0 %v1275_v50 }
  0xd6   : > { %769 = vmatpush1.bf16.msra.mxu1 %v1276_v51  ;;  %729 = vmatprep.subr.bf16.mxu0 %v1277_v53 }
  0xd7   : > { %770 = vmatprep.subr.bf16.mxu1 %v1279_v54 }
  0xd9   : > { %730 = vmatpush1.bf16.msra.mxu0 %v1281_v55 }
  0xda   : > { %771 = vmatpush1.bf16.msra.mxu1 %v1282_v56  ;;  %731 = vmatprep.subr.bf16.mxu0 %v1283_v57 }
  0xdb   : > { %772 = vmatprep.subr.bf16.mxu1 %v1285_v58 }
  0xdd   : > { %732 = vmatpush1.bf16.msra.mxu0 %v1287_v59 }
  0xde   : > { %773 = vmatpush1.bf16.msra.mxu1 %v1288_v60  ;;  %733 = vmatprep.subr.bf16.mxu0 %v1289_v61 }
  0xdf   : > { %774 = vmatprep.subr.bf16.mxu1 %v1291_v62 }
  0xe1   : > { %734 = vmatpush1.bf16.msra.mxu0 %v1293_v63 }
  0xe2   : > { %775 = vmatpush1.bf16.msra.mxu1 %v1294_v0  ;;  %735 = vmatprep.subr.bf16.mxu0 %v1295_v1 }
  0xe3   : > { %776 = vmatprep.subr.bf16.mxu1 %v1297_v2 }
  0xe5   : > { %736 = vmatpush1.bf16.msra.mxu0 %v1299_v3 }
  0xe6   : > { %777 = vmatpush1.bf16.msra.mxu1 %v1300_v4 }
  0xe8   : > { %738 = vmatmul.mubr.bf16.vlgmr.msra.gmra.mrb[0].mxu0 %v987_v5 }
  0xe9   : > { %779 = vmatmul.mubr.bf16.vlgmr.msra.gmra.mrb[0].mxu1 %v989_v6 }
 0x1bb   : > { %v739_v7 = vpop.f32.mrb[0].mxu0 }
 0x1bc   : > { %v780_v9 = vpop.f32.mrb[0].mxu1  ;;  %v741_v11 = vpop.f32.mrb[1].mxu0  ;;  %794 = sbr.rel (%p1055_p9) target bundleno = 461 (0x1cd), region = 52 }
 0x1bd   : > { %v781_v10 = vadd.f32 %v780_v9, %v739_v7  ;;  %v782_v13 = vpop.f32.mrb[1].mxu1  ;;  %v743_v15 = vpop.f32.mrb[2].mxu0 }
 0x1be   : > { %v783_v14 = vadd.f32 %v782_v13, %v741_v11  ;;  %v784_v16 = vpop.f32.mrb[2].mxu1  ;;  %v744_v18 = vpop.f32.mrb[3].mxu0 }
 0x1bf   : > { %v787_v17 = vadd.f32 %v781_v10, %v303_v8  ;;  %v785_v19 = vpop.f32.mrb[3].mxu1 }
 0x1c0   : > { %v788_v20 = vadd.f32 %v783_v14, %v304_v12 }
 0x1c1   : > { %789 = vst [vmem:[#allocation2] sm:$0xff] %v787_v17 }
 0x1c2   : > { %790 = vst [vmem:[#allocation2 + $0x8] sm:$0xff] %v788_v20 }
 0x1c8   : > { %v795_v26 = vld [vmem:[#allocation2] sm:$0xff] }
 0x1c9   : > { %v796_v27 = vld [vmem:[#allocation2 + $0x8] sm:$0xff]  ;;  %v809_v30 = vadd.f32 %v802_v28, %v795_v26 }
 0x1ca   : > { %v810_v31 = vadd.f32 %v806_v29, %v796_v27 }
 0x1cb   : > { %811 = vst [vmem:[%s1904_s1] sm:$0xff] %v809_v30 }
 0x1cc   : > { %812 = vst [vmem:[%s1904_s1 + $0x8] sm:$0xff] %v810_v31 }
 0x1cd PF: > { %s2106_s5 = sld [smem:[#allocation15_spill]]  ;;  %s2107_s22 = sld [smem:[#allocation22_spill]] }
 0x1ce   : > { %s830_s24 = sshll.u32 %s1904_s1, 4  ;;  %s814_s20 = scalar_lea.sflag [#allocation5], %s1894_s10  ;;  %s831_s24 = int_to_ptr.vmem [resolvable:$true] %s830_s24 }
 0x1cf   : > { %s1395_s29 = scalar_lea.vmem %s831_s24, 256  ;;  %p2109_p0 = scmp.ne.s32.totalorder %s2098_s30, 0 }
 0x1d0   : > { %p1396_p1 = scmp.ne.s32.totalorder %s831_s24, %s1395_s29  ;;  %s1558_s6 = smov [#allocation9]  }
 0x1d1   : > { %s1399_s26 = sshll.u32 %s1558_s6, 4  ;;  %s1400_s26 = int_to_ptr.vmem [resolvable:$false] %s1399_s26 }
 0x1d2   : > { %p1397_p5 = pnand %p1396_p1, %p2109_p0  ;;  %s1401_s3 = scalar_lea.vmem %s1400_s26, 512 }
 0x1d3   : > { %s1064_s21 = sshll.u32 %s2106_s5, 8  ;;  %s2108_s0 = smov %s2107_s22 }
 0x1d4   : > { %s1983_s15 = scalar_lea.hbm %s2107_s22, %s1064_s21  ;;  %p1398_p3 = pneg %p1397_p5 }
 0x1d5   : > { %p1402_p7 = scmp.lt.s32.totalorder %s831_s24, %s1400_s26  ;;  %p1403_p12 = scmp.lt.s32.totalorder %s1401_s3, %s1395_s29 }
 0x1d7   : > { %p1404_p8 = por %p1403_p12, %p1402_p7 }
 0x1d9   : > { %p1405_p13 = pnand %p1404_p8, %p1398_p3 }
 0x1db   : > { %1408 = shalt.err (!%p1405_p13)
}
 0x1dc   : > { %s1409_s10 = scalar_lea.hbm %s1983_s15, 256  ;;  %s1413_s8 = scalar_lea.hbm %s2108_s0, 1024 }
 0x1dd   : > { %p1410_p10 = scmp.ne.s32.totalorder %s1983_s15, %s1409_s10  ;;  %p1414_p6 = scmp.lt.u32.totalorder %s1983_s15, %s2108_s0 }
 0x1de   : > { %p1415_p11 = scmp.lt.u32.totalorder %s1413_s8, %s1409_s10  ;;  %p1417_p1 = scmp.lt.u32.totalorder %s1409_s10, %s1983_s15 }
 0x1df   : > { %p1411_p4 = pnand %p1410_p10, %p2109_p0 }
 0x1e0   : > { %p1416_p9 = por %p1415_p11, %p1414_p6 }
 0x1e1   : > { %p1412_p2 = pneg %p1411_p4 }
 0x1e2   : > { %p1418_p5 = por %p1417_p1, %p1416_p9 }
 0x1e4   : > { %p1419_p3 = pnand %p1418_p5, %p1412_p2 }
 0x1e6   : > { %1422 = shalt.err (!%p1419_p3)
}
 0x1e7   : > { %1071 = dma.vmem_to_hbm [thread:$0]  (%p2109_p0), %s831_s24, 256, %s1983_s15, %s814_s20  }
 0x1e8 PF: > { %p1088_p7 = scmp.ge.s32.totalorder %s1549_s25, 2  ;;  %s842_s21 = sand.u32 1, %s1497_s12  }
 0x1e9   : > { %p2110_p12 = scmp.ne.s32.totalorder %s2099_s7, 0  ;;  %s843_s18 = scalar_lea.sflag [#allocation5], %s842_s21 }
 0x1eb   : > { %p1084_p8 = pnand %p1088_p7, %p2110_p12 }
 0x1ed   : > { %1492 = dma.done.wait (!%p1084_p8), %s843_s18, 256  }
 0x1ee   : > { %1494 = vsyncadd (!%p1084_p8), %s843_s18, 4294967040  ;;  %s22_s25 = sadd.s32 1, %s1549_s25   ;;  %s2112_s30 = sld [smem:[#allocation14_spill]] }
 0x1ef   : > { %p2009_p13 = scmp.ge.s32.totalorder %s22_s25, 10   ;;  %s2113_s20 = sld [smem:[#allocation19_spill]] }
 0x1f0   : > { %s2114_s22 = sld [smem:[#allocation16_spill]]  ;;  %s2115_s7 = sld [smem:[#allocation17_spill]] }
 0x1f1   : > { %s2116_s24 = sld [smem:[#allocation18_spill]]  ;;  %s2117_s12 = smov %s1501_s13 }
 0x1f2   : > { %s2118_s13 = smov %s1505_s14  ;;  %s2119_s14 = smov %s1813_s4 }
 0x1f3   : > { %s2120_s15 = smov %s1513_s16  ;;  %s2121_s16 = smov %s1517_s17 }
 0x1f4   : > { %s2122_s17 = smov %s1765_s11  ;;  %s2123_s18 = smov %s1525_s19 }
 0x1f5   : > { %s2124_s19 = smov %s2112_s30  ;;  %s2125_s21 = smov %s1541_s23 }
 0x1f6   : > { %s2126_s23 = smov %s2115_s7  ;;  %21 = sbr.rel (!%p2009_p13) target bundleno = 16 (0x10), region = 109 }
 0x1fd   :  { %848 = vsyncpa [#allocation4], 1 }
 0x1fe   :  { %850 = vsyncpa [#allocation4 + $0x1], 1 }
 0x1ff   :  { %851 = vsyncpa [#allocation7], 1 }
 0x200   :  { %853 = vsyncpa [#allocation7 + $0x1], 1 }
 0x201   :  { %854 = vsyncpa [#allocation5], 1 }
 0x202   :  { %856 = vsyncpa [#allocation5 + $0x1], 1 }

</bundles_post_ra>
